<compile_context>
chip_gen: v6e
topology: v6e:2x2x1
jax: 0.10.0
libtpu: 0.0.40
codegen_flags: <defaults>
</compile_context>

<pallas_src>
import functools
import math

import jax
import jax.numpy as jnp
from jax import lax
from jax.experimental import pallas as pl
from jax.experimental.pallas import tpu as pltpu


def _round_up(x: int, m: int) -> int:
    return (x + m - 1) // m * m


def _num_tensorcores() -> int:
    """Best-effort TensorCore count (v7x: 2, v5e/v6e: 1). Falls back to 1."""
    try:
        info = pltpu.get_tpu_info()
        for attr in ("num_cores", "core_count", "num_tensorcores",
                     "tensorcore_count", "cores_per_chip"):
            v = getattr(info, attr, None)
            if isinstance(v, int) and v > 0:
                return v
    except Exception:
        pass
    return 1


def _sinusoidal_kernel(t_ref, o_ref, *, half_dim, dim_pad, scale, mask_tail):
    """One batch tile.

    t_ref: (TB, 1)        float32 -- time values as a column vector
    o_ref: (TB, dim_pad)  float32 -- [sin(t*f_0..f_{H-1}) | cos(...) | 0 pad]
    """
    t = t_ref[...]                                                # (TB, 1)
    c = lax.broadcasted_iota(jnp.int32, (1, dim_pad), 1)          # column idx
    is_cos = c >= half_dim
    # Frequency index per column (cos half reuses sin-half frequencies).
    k = jnp.where(is_cos, c - half_dim, c).astype(jnp.float32)
    f = jnp.exp(k * jnp.float32(-scale))                          # (1, dim_pad)
    # cos(x) = sin(x + pi/2): one fused transcendental pass over all columns.
    phase = jnp.where(is_cos, jnp.float32(0.5 * math.pi), jnp.float32(0.0))
    emb = t * f + phase                                           # (TB, dim_pad)
    val = jnp.sin(emb)
    if mask_tail:
        # Zero the lane padding (and the odd-dim trailing column).
        val = jnp.where(c < 2 * half_dim, val, jnp.float32(0.0))
    o_ref[...] = val                                              # one dense vst


def sinusoidal_pos_emb(time_values: jax.Array, dim: int) -> jax.Array:
    """JAX/Pallas equivalent of SinusoidalPosEmb(dim)(time_values).

    time_values: (B,) float array
    returns:     (B, dim) float32
    """
    assert time_values.ndim == 1, "expects a 1-D vector of time values"
    half_dim = dim // 2
    assert half_dim > 1, "dim must be >= 4 (reference divides by half_dim - 1)"
    b = time_values.shape[0]

    scale = math.log(10000.0) / (half_dim - 1)

    dim_pad = _round_up(dim, 128)        # lane-dense output width
    b8 = _round_up(b, 8)                 # sublane-aligned batch

    # Per-tile output budget (~4 MiB per buffer; double-buffered ~8 MiB),
    # safe on all generations including v7x's smaller VMEM.
    vmem_budget = 4 * 1024 * 1024
    tb_cap = max(8, (vmem_budget // (dim_pad * 4)) // 8 * 8)

    # Balanced tiling: only 8-row sublane padding on the batch; at least one
    # tile per TensorCore so v7x shards across both cores, while v5e/v6e keep
    # a single grid step (grid is a sequential loop there).
    m = b8 // 8
    n_tiles = max(pl.cdiv(b8, tb_cap), min(_num_tensorcores(), m))
    tb = 8 * pl.cdiv(m, n_tiles)
    grid_n = pl.cdiv(b8, tb)
    b_pad = grid_n * tb

    t_pad = jnp.pad(time_values.astype(jnp.float32), (0, b_pad - b))
    t2d = t_pad.reshape(b_pad, 1)

    kernel = functools.partial(
        _sinusoidal_kernel,
        half_dim=half_dim,
        dim_pad=dim_pad,
        scale=scale,
        mask_tail=(2 * half_dim < dim_pad),
    )

    out = pl.pallas_call(
        kernel,
        out_shape=jax.ShapeDtypeStruct((b_pad, dim_pad), jnp.float32),
        grid=(grid_n,),
        in_specs=[pl.BlockSpec((tb, 1), lambda i: (i, 0))],
        out_specs=pl.BlockSpec((tb, dim_pad), lambda i: (i, 0)),
        compiler_params=pltpu.CompilerParams(
            dimension_semantics=("parallel",)),
    )(t2d)

    # Contiguous strip of batch / lane padding (no-op when nothing was padded).
    return out[:b, :dim]


def _reference(time_values: jax.Array, dim: int) -> jax.Array:
    """Pure-JAX reference mirroring the PyTorch forward exactly."""
    half_dim = dim // 2
    scale = math.log(10000.0) / (half_dim - 1)
    freqs = jnp.exp(jnp.arange(half_dim, dtype=jnp.float32) * -scale)
    emb = time_values.astype(jnp.float32)[:, None] * freqs[None, :]
    emb = jnp.concatenate([jnp.sin(emb), jnp.cos(emb)], axis=-1)
    if dim % 2 == 1:
        emb = jnp.concatenate([emb, jnp.zeros_like(emb[:, :1])], axis=-1)
    return emb


if __name__ == "__main__":
    key = jax.random.PRNGKey(0)
    batch = 8
    dim = 32  # embedding dimension (even)

    # Deterministic example input: log-SNR-like time values.
    time_values = jax.random.normal(key, (batch,), dtype=jnp.float32) * 5.0

    out = sinusoidal_pos_emb(time_values, dim)
    out = jax.block_until_ready(out)

    ref = _reference(time_values, dim)
    assert out.shape == (batch, dim), out.shape
    # cos(x) = sin(x + pi/2) fusion is ~1-ulp off jnp.cos; well within tol.
    assert jnp.allclose(out, ref, atol=1e-4, rtol=1e-5), "mismatch vs reference"

    print("KERNEL_OK")
</pallas_src>

<mosaic_0001>
module attributes {stable_mosaic.version = 11 : i64} {
  func.func @_sinusoidal_kernel(%arg0: i32, %arg1: memref<8x1xf32, #tpu.memory_space<vmem>>, %arg2: memref<8x128xf32, #tpu.memory_space<vmem>>) attributes {dimension_semantics = [#tpu.dimension_semantics<parallel>], iteration_bounds = array<i64: 1>, scalar_prefetch = 0 : i64, scratch_operands = 0 : i64, tpu.core_type = #tpu.core_type<tc>, window_params = [{transform_indices = @transform_0, window_bounds = array<i64: 8, 1>}, {transform_indices = @transform_1, window_bounds = array<i64: 8, 128>}]} {
    %c0 = arith.constant 0 : index
    %c0_0 = arith.constant 0 : index
    %0 = vector.load %arg1[%c0, %c0_0] : memref<8x1xf32, #tpu.memory_space<vmem>>, vector<8x1xf32>
    %1 = tpu.iota {dimensions = array<i32: 1>} : vector<1x128xi32>
    %c16_i32 = arith.constant 16 : i32
    %2 = vector.broadcast %c16_i32 : i32 to vector<1x128xi32>
    %3 = arith.cmpi sge, %1, %2 : vector<1x128xi32>
    %c16_i32_1 = arith.constant 16 : i32
    %4 = vector.broadcast %c16_i32_1 : i32 to vector<1x128xi32>
    %5 = arith.subi %1, %4 : vector<1x128xi32>
    %6 = arith.select %3, %5, %1 : vector<1x128xi1>, vector<1x128xi32>
    %7 = arith.sitofp %6 : vector<1x128xi32> to vector<1x128xf32>
    %cst = arith.constant -0.614022672 : f32
    %8 = vector.broadcast %cst : f32 to vector<1x128xf32>
    %9 = arith.mulf %7, %8 : vector<1x128xf32>
    %10 = math.exp %9 : vector<1x128xf32>
    %cst_2 = arith.constant 1.57079637 : f32
    %cst_3 = arith.constant 0.000000e+00 : f32
    %11 = vector.broadcast %cst_2 : f32 to vector<1x128xf32>
    %12 = vector.broadcast %cst_3 : f32 to vector<1x128xf32>
    %13 = arith.select %3, %11, %12 : vector<1x128xi1>, vector<1x128xf32>
    %14 = vector.broadcast %0 : vector<8x1xf32> to vector<8x128xf32>
    %15 = vector.broadcast %10 : vector<1x128xf32> to vector<8x128xf32>
    %16 = arith.mulf %14, %15 : vector<8x128xf32>
    %17 = vector.broadcast %13 : vector<1x128xf32> to vector<8x128xf32>
    %18 = arith.addf %16, %17 : vector<8x128xf32>
    %19 = math.sin %18 : vector<8x128xf32>
    %c32_i32 = arith.constant 32 : i32
    %20 = vector.broadcast %c32_i32 : i32 to vector<1x128xi32>
    %21 = arith.cmpi slt, %1, %20 : vector<1x128xi32>
    %cst_4 = arith.constant 0.000000e+00 : f32
    %22 = vector.shape_cast %21 : vector<1x128xi1> to vector<1x128xi1>
    %23 = vector.broadcast %22 : vector<1x128xi1> to vector<8x128xi1>
    %24 = vector.broadcast %cst_4 : f32 to vector<8x128xf32>
    %25 = arith.select %23, %19, %24 : vector<8x128xi1>, vector<8x128xf32>
    %c0_5 = arith.constant 0 : index
    %c0_6 = arith.constant 0 : index
    %26 = vector.load %arg2[%c0_5, %c0_6] : memref<8x128xf32, #tpu.memory_space<vmem>>, vector<8x128xf32>
    tpu.vector_store %arg2[%c0_5, %c0_6], %25 {strides = array<i32>} : memref<8x128xf32, #tpu.memory_space<vmem>>, vector<8x128xf32>,
    return
  }
  func.func @transform_0(%arg0: i32) -> (i32, i32) {
    %c0_i32 = arith.constant 0 : i32
    %c0_i32_0 = arith.constant 0 : i32
    return %arg0, %c0_i32 : i32, i32
  }
  func.func @transform_1(%arg0: i32) -> (i32, i32) {
    %c0_i32 = arith.constant 0 : i32
    %c0_i32_0 = arith.constant 0 : i32
    return %arg0, %c0_i32 : i32, i32
  }
}

</mosaic_0001>

<bundles_post_ra>
// kernel: tpu_custom_call.1
= control target key start
LH: loop header
LB: loop body
LE: loop exit
PB: predicated region body
PF: predicated region fallthrough
CT: control target
= control target key end

     0   :  { %v197_v1 = vmov 0   ;;  %s249_s0 = inlined_call_operand.vmem [shape: f32[8,1], index: 0, kind: input, shape index: {}]   ;;  %s250_s1 = inlined_call_operand.hbm [shape: f32[8,128], index: 1, kind: output, shape index: {}]  }
   0x1   :  { %v9_v0 = vld [vmem:[%s249_s0] sm:$0xff]  ;;  %168 = vset.pattern.permute.xlu0 %v197_v1 }
   0x2   :  { %6 = vsyncpa [#allocation3], 0  ;;  %22 = vperm.xlu0 %168, %v9_v0   ;;  %v10_v2 = vlaneseq  ;;  %v198_v10 = vmov 0.0   ;;  %v199_v26 = vmov 2102212464   ;;  %s205_s0 = smov [#allocation2]  }
   0x3   :  { %v200_v28 = vmov 920167782   ;;  %v201_v32 = vmov 1326507024   ;;  %v202_v34 = vmov 683565275  }
   0x4   :  { %v219_v3 = vand.u32 127, %v10_v2  ;;  %v203_v36 = vmov 2475754826   ;;  %v204_v39 = vmov 2131351028   ;;  %s142_s8 = sshll.u32 %s205_s0, 4  ;;  %s143_s8 = int_to_ptr.vmem [resolvable:$true] %s142_s8 }
   0x5   :  { %s175_s9 = scalar_lea.vmem %s143_s8, 128  ;;  %p180_p1 = scmp.lt.s32.totalorder %s143_s8, %s143_s8 }
   0x6   :  { %v150_v4 = vadd.s32 4294967280, %v219_v3  ;;  %vm12_vm0 = vcmp.ge.s32.totalorder %v219_v3, 16  ;;  %vm131_vm13 = vcmp.lt.s32.totalorder %v219_v3, 32  ;;  %p176_p0 = scmp.ne.s32.totalorder %s143_s8, %s175_s9  ;;  %p181_p2 = scmp.lt.s32.totalorder %s175_s9, %s175_s9 }
   0x7   :  { %v19_v11 = vsel %vm12_vm0, 1.5707964, %v198_v10 }
   0x8   :  { %v14_v5 = vsel %vm12_vm0, %v150_v4, %v219_v3  ;;  %p182_p3 = por %p181_p2, %p180_p1 }
   0x9   :  { %v15_v6 = vcvt.s32.f32 %v14_v5 }
   0xa   :  { %p183_p4 = pnand %p182_p3, %p176_p0 }
   0xb   :  { %v16_v7 = vmul.f32 -0.6140227, %v15_v6 }
   0xd   :  { %v17_v8 = vmul.f32 1.442695, %v16_v7 }
   0xf   :  { %169 = vpow2.f32 %v17_v8 }
  0x1c   :  { %v170_v9 = vpop.eup %169 }
  0x7d   :  { %v23_v12 = vpop.permute.xlu0 %22 }
  0x7e   :  { %v25_v13 = vmul.f32 %v170_v9, %v23_v12 }
  0x80   :  { %v224_v14 = vadd.f32 %v25_v13, %v19_v11 }
  0x82   :  { %v30_v15 = vand.u32 2139095040, %v224_v14  ;;  %v27_v16 = vand.u32 2147483647, %v224_v14  ;;  %vm29_vm8 = vcmp.lt.s32.totalorder %v224_v14, 0  ;;  %vm119_vm14 = vweird.f32 %v224_v14 }
  0x84   :  { %v31_v17 = vshrl.u32 %v30_v15, 23  ;;  %v34_v19 = vand.u32 8388607, %v27_v16  ;;  %vm28_vm9 = vcmp.le.f32.partialorder %v27_v16, 0.7853982 }
  0x86   :  { %v151_v18 = vadd.s32 4294967169, %v31_v17  ;;  %v35_v22 = vor.u32 8388608, %v34_v19 }
  0x88   :  { %v37_v20 = vadd.s32 1, %v151_v18  ;;  %v75_v30 = vshll.u32 %v35_v22, 8 }
  0x8a   :  { %vm38_vm1 = vcmp.gt.s32.totalorder %v37_v20, 0 }
  0x8b   :  { %v39_v21 = vsel %vm38_vm1, %v37_v20, 0 }
  0x8c   :  { %v41_v23 = vand.u32 31, %v39_v21  ;;  %v40_v24 = vshrl.u32 %v39_v21, 5 }
  0x8e   :  { %v42_v25 = vsub.s32 32, %v41_v23  ;;  %v53_v27 = vshll.u32 %v199_v26, %v41_v23  ;;  %v56_v29 = vshll.u32 %v200_v28, %v41_v23  ;;  %v44_v35 = vshll.u32 %v202_v34, %v41_v23 }
  0x8f   :  { %v47_v38 = vshll.u32 %v203_v36, %v41_v23  ;;  %v50_v41 = vshll.u32 %v204_v39, %v41_v23  ;;  %vm62_vm2 = vcmp.lt.s32.totalorder %v40_v24, 4  ;;  %vm59_vm3 = vcmp.lt.s32.totalorder %v40_v24, 1 }
  0x90   :  { %v54_v31 = vshrl.u32 %v200_v28, %v42_v25  ;;  %v57_v33 = vshrl.u32 %v201_v32, %v42_v25  ;;  %v45_v37 = vshrl.u32 %v203_v36, %v42_v25  ;;  %v48_v40 = vshrl.u32 %v204_v39, %v42_v25 }
  0x91   :  { %v51_v42 = vshrl.u32 %v199_v26, %v42_v25  ;;  %v43_v46 = vshrl.u32 %v202_v34, %v42_v25  ;;  %vm60_vm4 = vcmp.lt.s32.totalorder %v40_v24, 2  ;;  %vm61_vm5 = vcmp.lt.s32.totalorder %v40_v24, 3 }
  0x92   :  { %v55_v43 = vor.u32 %v54_v31, %v53_v27  ;;  %v58_v44 = vor.u32 %v57_v33, %v56_v29  ;;  %v46_v45 = vor.u32 %v45_v37, %v44_v35  ;;  %v49_v47 = vor.u32 %v48_v40, %v47_v38 }
  0x93   :  { %v52_v48 = vor.u32 %v51_v42, %v50_v41 }
  0x94   :  { %v68_v49 = vsel %vm62_vm2, %v55_v43, 920167782  ;;  %v72_v50 = vsel %vm62_vm2, %v58_v44, 1326507024  ;;  %v67_v52 = vsel %vm59_vm3, %v46_v45, %v49_v47  ;;  %v63_v55 = vsel %vm59_vm3, %v43_v46, %v46_v45 }
  0x95   :  { %v64_v51 = vsel %vm62_vm2, %v52_v48, 2102212464  ;;  %v69_v53 = vsel %vm61_vm5, %v52_v48, %v68_v49  ;;  %v71_v54 = vsel %vm59_vm3, %v49_v47, %v52_v48  ;;  %v73_v58 = vsel %vm61_vm5, %v55_v43, %v72_v50 }
  0x96   :  { %v65_v56 = vsel %vm61_vm5, %v49_v47, %v64_v51  ;;  %v70_v57 = vsel %vm60_vm4, %v67_v52, %v69_v53  ;;  %v74_v59 = vsel %vm60_vm4, %v71_v54, %v73_v58 }
  0x97   :  { %v230_v60 = vmul.u32.u64.low %v75_v30, %v70_v57  ;;  %v231_v61 = vmul.u32.u64.high %v75_v30, %v70_v57, %v230_v60  ;;  %v233_v62 = vmul.u32.u64.low %v75_v30, %v74_v59  ;;  %v234_v63 = vmul.u32.u64.high %v75_v30, %v74_v59, %v233_v62 }
  0x98   :  { %v66_v0 = vsel %vm60_vm4, %v63_v55, %v65_v56 }
  0x99   :  { %v85_v1 = vadd.s32 1, %v231_v61  ;;  %v82_v2 = vmul.u32 %v75_v30, %v66_v0  ;;  %vm84_vm6 = vc.u32 %v234_v63, %v230_v60  ;;  %v83_v17 = vadd.s32 %v230_v60, %v234_v63 }
  0x9b   :  { %v86_v4 = vsel %vm84_vm6, %v85_v1, %v231_v61 }
  0x9c   :  { %v87_v5 = vadd.s32 %v86_v4, %v82_v2 }
  0x9e   :  { %v88_v6 = vadd.s32 536870912, %v87_v5 }
  0xa0   :  { %v89_v7 = vshrl.u32 %v88_v6, 30 }
  0xa2   :  { %v90_v8 = vshll.u32 %v89_v7, 30  ;;  %v113_v30 = vsub.s32 4, %v89_v7 }
  0xa4   :  { %v91_v9 = vsub.s32 %v87_v5, %v90_v8  ;;  %v114_v33 = vsel %vm29_vm8, %v113_v30, %v89_v7 }
  0xa5   :  { %v116_v34 = vsel %vm28_vm9, 0, %v114_v33 }
  0xa6   :  { %v93_v10 = vsub.s32 0, %v91_v9  ;;  %v120_v35 = vadd.s32 3, %v116_v34 }
  0xa8   :  { %v152_v11 = vmin.u32 %v93_v10, %v91_v9  ;;  %v121_v36 = vand.u32 3, %v120_v35 }
  0xaa   :  { %v95_v12 = vclz %v152_v11  ;;  %vm126_vm10 = vcmp.eq.s32.totalorder %v121_v36, 2  ;;  %vm123_vm11 = vcmp.eq.s32.totalorder %v121_v36, 0  ;;  %vm122_vm12 = vcmp.lt.s32.totalorder %v121_v36, 2 }
  0xac   :  { %v153_v13 = vadd.s32 4294967294, %v95_v12 }
  0xae   :  { %vm154_vm7 = vcmp.lt.s32.totalorder %v153_v13, 0 }
  0xaf   :  { %v98_v15 = vsel %vm154_vm7, 0, %v153_v13 }
  0xb0   :  { %v99_v18 = vsub.s32 32, %v98_v15  ;;  %v103_v19 = vsub.s32 4294967266, %v98_v15  ;;  %v100_v20 = vshll.u32 %v91_v9, %v98_v15 }
  0xb2   :  { %v101_v21 = vshrl.u32 %v83_v17, %v99_v18  ;;  %v104_v22 = vadd.s32 127, %v103_v19 }
  0xb4   :  { %v102_v23 = vor.u32 %v101_v21, %v100_v20  ;;  %v105_v24 = vshll.u32 %v104_v22, 23 }
  0xb6   :  { %v106_v25 = vor.u32 4788187, %v105_v24  ;;  %v109_v27 = vcvt.s32.f32 %v102_v23 }
  0xb8   :  { %v107_v26 = vand.u32 2147483647, %v106_v25 }
  0xba   :  { %v110_v28 = vmul.f32 %v109_v27, %v107_v26 }
  0xbc   :  { %v111_v29 = vxor.u32 2147483648, %v110_v28 }
  0xbe   :  { %v112_v31 = vsel %vm29_vm8, %v111_v29, %v110_v28 }
  0xbf   :  { %v115_v32 = vsel %vm28_vm9, %v224_v14, %v112_v31 }
  0xc0   :  { %171 = vcosq.f32 %v115_v32 }
  0xc1   :  { %173 = vsinq.f32 %v115_v32 }
  0xcd   :  { %v172_v37 = vpop.eup %171 }
  0xce   :  { %v174_v38 = vpop.eup %173  ;;  %v127_v39 = vxor.u32 2147483648, %v172_v37 }
  0xcf   :  { %v124_v40 = vxor.u32 2147483648, %v174_v38 }
  0xd0   :  { %v128_v41 = vsel %vm126_vm10, %v127_v39, %v174_v38 }
  0xd1   :  { %v125_v16 = vsel %vm123_vm11, %v172_v37, %v124_v40 }
  0xd2   :  { %v129_v42 = vsel %vm122_vm12, %v125_v16, %v128_v41 }
  0xd3   :  { %v130_v43 = vsel %vm119_vm14, nan, %v129_v42 }
  0xd4   :  { %v134_v44 = vsel %vm131_vm13, %v130_v43, 0.0 }
  0xd5   :  { %135 = vst [vmem:[#allocation2] sm:$0xff] %v134_v44 }
  0xd6   :  { %186 = shalt.err (!%p183_p4)
}
  0xd7   :  { %145 = dma.vmem_to_hbm [thread:$0]  %s143_s8, 128, %s250_s1, [#allocation3]  }
  0xd8   :  { %195 = dma.done.wait [#allocation3], 128  }
  0xd9   :  { %196 = vsyncadd [#allocation3], 4294967168 }
  0xda   :  { %149 = vsyncpa [#allocation3], 1 }

</bundles_post_ra>
